<compile_context>
chip_gen: v7x
topology: tpu7x:2x2x1
jax: 0.10.0
libtpu: 0.0.40
codegen_flags: <defaults>
</compile_context>

<pallas_src>
import jax
import jax.numpy as jnp
from jax.experimental import pallas as pl
from jax.experimental.pallas import tpu as pltpu

_IN, _H1, _H2, _OUT = 784, 60, 120, 10
_TB_MAX = 1024  # batch-tile rows; keeps total VMEM footprint < ~10 MiB


def _mlp_kernel(x_ref, w1_ref, b1_ref, w2_ref, b2_ref, w3_ref, b3_ref, o_ref):
    # One batch tile per grid step; all weights resident in VMEM.
    # Cast to bf16 *inside* the kernel (free vs. the dominant x DMA); f32 acc.
    x = x_ref[...].astype(jnp.bfloat16)                             # [TB, 784]
    h1 = jnp.dot(x, w1_ref[...].astype(jnp.bfloat16),
                 preferred_element_type=jnp.float32)
    h1 = jnp.maximum(h1 + b1_ref[...], 0.0)                         # [TB, 60]  f32
    h2 = jnp.dot(h1.astype(jnp.bfloat16), w2_ref[...].astype(jnp.bfloat16),
                 preferred_element_type=jnp.float32)
    h2 = jnp.maximum(h2 + b2_ref[...], 0.0)                         # [TB, 120] f32
    out = jnp.dot(h2.astype(jnp.bfloat16), w3_ref[...].astype(jnp.bfloat16),
                  preferred_element_type=jnp.float32)
    o_ref[...] = (out + b3_ref[...]).astype(o_ref.dtype)            # [TB, 10]


def _pick_batch_tile(B):
    """Pick a sublane-aligned batch tile, preferring tiles that divide B so the
    wrapper never has to materialize a padded copy of x."""
    if B <= _TB_MAX:
        return max(8, ((B + 7) // 8) * 8)           # single grid step
    for tb in range(_TB_MAX, _TB_MAX // 2 - 1, -8):  # divisor in [TB_MAX/2, TB_MAX]
        if B % tb == 0:
            return tb                                # exact fit: no padding copy
    return _TB_MAX                                   # fallback: pad the tail


def model4_forward(x, params):
    """x: [B, 1, 28, 28] (or any [B, ...] flattening to 784). Returns [B, 10] f32."""
    B = x.shape[0]
    x2d = x.reshape(B, -1)
    assert x2d.shape[1] == _IN, "Model_4 expects 784 input features"
    w1, b1, w2, b2, w3, b3 = params

    tb = _pick_batch_tile(B)
    b_pad = pl.cdiv(B, tb) * tb
    if b_pad != B:
        x2d = jnp.pad(x2d, ((0, b_pad - B), (0, 0)))
    grid = (b_pad // tb,)

    const = lambda shape: pl.BlockSpec(shape, lambda i: (0, 0))  # VMEM-resident weights

    out = pl.pallas_call(
        _mlp_kernel,
        out_shape=jax.ShapeDtypeStruct((b_pad, _OUT), jnp.float32),
        grid=grid,
        in_specs=[
            pl.BlockSpec((tb, _IN), lambda i: (i, 0)),   # x: streamed per batch tile
            const((_IN, _H1)), const((1, _H1)),
            const((_H1, _H2)), const((1, _H2)),
            const((_H2, _OUT)), const((1, _OUT)),
        ],
        out_specs=pl.BlockSpec((tb, _OUT), lambda i: (i, 0)),
        compiler_params=pltpu.CompilerParams(
            dimension_semantics=("parallel",)),
    )(x2d, w1, b1, w2, b2, w3, b3)
    return out[:B]


def init_params(key):
    """nn.Linear-style init U(-1/sqrt(fan_in), +1/sqrt(fan_in)).
    Weights stored [in, out]; biases [1, out] for TPU-friendly broadcast."""
    ks = jax.random.split(key, 6)

    def linear(kw, kb, fan_in, fan_out):
        bound = 1.0 / jnp.sqrt(jnp.float32(fan_in))
        w = jax.random.uniform(kw, (fan_in, fan_out), jnp.float32, -bound, bound)
        b = jax.random.uniform(kb, (1, fan_out), jnp.float32, -bound, bound)
        return w, b

    w1, b1 = linear(ks[0], ks[1], _IN, _H1)
    w2, b2 = linear(ks[2], ks[3], _H1, _H2)
    w3, b3 = linear(ks[4], ks[5], _H2, _OUT)
    return (w1, b1, w2, b2, w3, b3)


def _reference(x, params):
    """Plain-JAX f32 reference of Model_4.forward."""
    w1, b1, w2, b2, w3, b3 = params
    h = x.reshape(x.shape[0], -1).astype(jnp.float32)
    h = jnp.maximum(h @ w1 + b1, 0.0)
    h = jnp.maximum(h @ w2 + b2, 0.0)
    return h @ w3 + b3


if __name__ == "__main__":
    key = jax.random.PRNGKey(0)
    k_x, k_p = jax.random.split(key)

    # Small MNIST-like batch: [B=2, C=1, H=28, W=28] -> 784 features.
    x = jax.random.normal(k_x, (2, 1, 28, 28), jnp.float32)
    params = init_params(k_p)

    out = model4_forward(x, params)
    out = jax.block_until_ready(out)

    ref = _reference(x, params)
    assert out.shape == (2, 10)
    # Loose tolerance: kernel runs matmuls in bf16 (f32 accumulation).
    assert jnp.allclose(out, ref, atol=5e-2, rtol=5e-2)

    print("KERNEL_OK")
</pallas_src>

<mosaic_0001>
module attributes {stable_mosaic.version = 11 : i64} {
  func.func @_mlp_kernel(%arg0: i32, %arg1: memref<8x784xf32, #tpu.memory_space<vmem>>, %arg2: memref<784x60xf32, #tpu.memory_space<vmem>>, %arg3: memref<1x60xf32, #tpu.memory_space<vmem>>, %arg4: memref<60x120xf32, #tpu.memory_space<vmem>>, %arg5: memref<1x120xf32, #tpu.memory_space<vmem>>, %arg6: memref<120x10xf32, #tpu.memory_space<vmem>>, %arg7: memref<1x10xf32, #tpu.memory_space<vmem>>, %arg8: memref<8x10xf32, #tpu.memory_space<vmem>>) attributes {dimension_semantics = [#tpu.dimension_semantics<parallel>], iteration_bounds = array<i64: 1>, scalar_prefetch = 0 : i64, scratch_operands = 0 : i64, tpu.core_type = #tpu.core_type<tc>, window_params = [{transform_indices = @transform_0, window_bounds = array<i64: 8, 784>}, {pipeline_mode = #tpu.pipeline_mode<synchronous>, transform_indices = @transform_1, window_bounds = array<i64: 784, 60>}, {pipeline_mode = #tpu.pipeline_mode<synchronous>, transform_indices = @transform_2, window_bounds = array<i64: 1, 60>}, {pipeline_mode = #tpu.pipeline_mode<synchronous>, transform_indices = @transform_3, window_bounds = array<i64: 60, 120>}, {pipeline_mode = #tpu.pipeline_mode<synchronous>, transform_indices = @transform_4, window_bounds = array<i64: 1, 120>}, {pipeline_mode = #tpu.pipeline_mode<synchronous>, transform_indices = @transform_5, window_bounds = array<i64: 120, 10>}, {pipeline_mode = #tpu.pipeline_mode<synchronous>, transform_indices = @transform_6, window_bounds = array<i64: 1, 10>}, {transform_indices = @transform_7, window_bounds = array<i64: 8, 10>}]} {
    %c0 = arith.constant 0 : index
    %c0_0 = arith.constant 0 : index
    %0 = vector.load %arg1[%c0, %c0_0] : memref<8x784xf32, #tpu.memory_space<vmem>>, vector<8x784xf32>
    %1 = arith.truncf %0 : vector<8x784xf32> to vector<8x784xbf16>
    %c0_1 = arith.constant 0 : index
    %c0_2 = arith.constant 0 : index
    %2 = vector.load %arg2[%c0_1, %c0_2] : memref<784x60xf32, #tpu.memory_space<vmem>>, vector<784x60xf32>
    %3 = arith.truncf %2 : vector<784x60xf32> to vector<784x60xbf16>
    %cst = arith.constant dense<0.000000e+00> : vector<8x60xf32>
    %4 = tpu.matmul %1, %3, %cst {dimension_numbers = #tpu.dot_dimension_numbers<[1], [0], [0], [1], [0, 0, 1, 1], [], []>} : vector<8x784xbf16>, vector<784x60xbf16>, vector<8x60xf32> -> vector<8x60xf32>
    %c0_3 = arith.constant 0 : index
    %c0_4 = arith.constant 0 : index
    %5 = vector.load %arg3[%c0_3, %c0_4] : memref<1x60xf32, #tpu.memory_space<vmem>>, vector<1x60xf32>
    %6 = vector.broadcast %5 : vector<1x60xf32> to vector<8x60xf32>
    %7 = arith.addf %4, %6 : vector<8x60xf32>
    %cst_5 = arith.constant 0.000000e+00 : f32
    %8 = vector.broadcast %cst_5 : f32 to vector<8x60xf32>
    %9 = arith.maximumf %7, %8 : vector<8x60xf32>
    %10 = arith.truncf %9 : vector<8x60xf32> to vector<8x60xbf16>
    %c0_6 = arith.constant 0 : index
    %c0_7 = arith.constant 0 : index
    %11 = vector.load %arg4[%c0_6, %c0_7] : memref<60x120xf32, #tpu.memory_space<vmem>>, vector<60x120xf32>
    %12 = arith.truncf %11 : vector<60x120xf32> to vector<60x120xbf16>
    %cst_8 = arith.constant dense<0.000000e+00> : vector<8x120xf32>
    %13 = tpu.matmul %10, %12, %cst_8 {dimension_numbers = #tpu.dot_dimension_numbers<[1], [0], [0], [1], [0, 0, 1, 1], [], []>} : vector<8x60xbf16>, vector<60x120xbf16>, vector<8x120xf32> -> vector<8x120xf32>
    %c0_9 = arith.constant 0 : index
    %c0_10 = arith.constant 0 : index
    %14 = vector.load %arg5[%c0_9, %c0_10] : memref<1x120xf32, #tpu.memory_space<vmem>>, vector<1x120xf32>
    %15 = vector.broadcast %14 : vector<1x120xf32> to vector<8x120xf32>
    %16 = arith.addf %13, %15 : vector<8x120xf32>
    %cst_11 = arith.constant 0.000000e+00 : f32
    %17 = vector.broadcast %cst_11 : f32 to vector<8x120xf32>
    %18 = arith.maximumf %16, %17 : vector<8x120xf32>
    %19 = arith.truncf %18 : vector<8x120xf32> to vector<8x120xbf16>
    %c0_12 = arith.constant 0 : index
    %c0_13 = arith.constant 0 : index
    %20 = vector.load %arg6[%c0_12, %c0_13] : memref<120x10xf32, #tpu.memory_space<vmem>>, vector<120x10xf32>
    %21 = arith.truncf %20 : vector<120x10xf32> to vector<120x10xbf16>
    %cst_14 = arith.constant dense<0.000000e+00> : vector<8x10xf32>
    %22 = tpu.matmul %19, %21, %cst_14 {dimension_numbers = #tpu.dot_dimension_numbers<[1], [0], [0], [1], [0, 0, 1, 1], [], []>} : vector<8x120xbf16>, vector<120x10xbf16>, vector<8x10xf32> -> vector<8x10xf32>
    %c0_15 = arith.constant 0 : index
    %c0_16 = arith.constant 0 : index
    %23 = vector.load %arg7[%c0_15, %c0_16] : memref<1x10xf32, #tpu.memory_space<vmem>>, vector<1x10xf32>
    %24 = vector.broadcast %23 : vector<1x10xf32> to vector<8x10xf32>
    %25 = arith.addf %22, %24 : vector<8x10xf32>
    %c0_17 = arith.constant 0 : index
    %c0_18 = arith.constant 0 : index
    %26 = vector.load %arg8[%c0_17, %c0_18] : memref<8x10xf32, #tpu.memory_space<vmem>>, vector<8x10xf32>
    tpu.vector_store %arg8[%c0_17, %c0_18], %25 {strides = array<i32>} : memref<8x10xf32, #tpu.memory_space<vmem>>, vector<8x10xf32>,
    return
  }
  func.func @transform_0(%arg0: i32) -> (i32, i32) {
    %c0_i32 = arith.constant 0 : i32
    %c0_i32_0 = arith.constant 0 : i32
    return %arg0, %c0_i32 : i32, i32
  }
  func.func @transform_1(%arg0: i32) -> (i32, i32) {
    %c0_i32 = arith.constant 0 : i32
    %c0_i32_0 = arith.constant 0 : i32
    %c0_i32_1 = arith.constant 0 : i32
    return %c0_i32, %c0_i32_0 : i32, i32
  }
  func.func @transform_2(%arg0: i32) -> (i32, i32) {
    %c0_i32 = arith.constant 0 : i32
    %c0_i32_0 = arith.constant 0 : i32
    %c0_i32_1 = arith.constant 0 : i32
    return %c0_i32, %c0_i32_0 : i32, i32
  }
  func.func @transform_3(%arg0: i32) -> (i32, i32) {
    %c0_i32 = arith.constant 0 : i32
    %c0_i32_0 = arith.constant 0 : i32
    %c0_i32_1 = arith.constant 0 : i32
    return %c0_i32, %c0_i32_0 : i32, i32
  }
  func.func @transform_4(%arg0: i32) -> (i32, i32) {
    %c0_i32 = arith.constant 0 : i32
    %c0_i32_0 = arith.constant 0 : i32
    %c0_i32_1 = arith.constant 0 : i32
    return %c0_i32, %c0_i32_0 : i32, i32
  }
  func.func @transform_5(%arg0: i32) -> (i32, i32) {
    %c0_i32 = arith.constant 0 : i32
    %c0_i32_0 = arith.constant 0 : i32
    %c0_i32_1 = arith.constant 0 : i32
    return %c0_i32, %c0_i32_0 : i32, i32
  }
  func.func @transform_6(%arg0: i32) -> (i32, i32) {
    %c0_i32 = arith.constant 0 : i32
    %c0_i32_0 = arith.constant 0 : i32
    %c0_i32_1 = arith.constant 0 : i32
    return %c0_i32, %c0_i32_0 : i32, i32
  }
  func.func @transform_7(%arg0: i32) -> (i32, i32) {
    %c0_i32 = arith.constant 0 : i32
    %c0_i32_0 = arith.constant 0 : i32
    return %arg0, %c0_i32 : i32, i32
  }
}

</mosaic_0001>

<bundles_post_ra>
// kernel: tpu_custom_call.1
= control target key start
LH: loop header
LB: loop body
LE: loop exit
PB: predicated region body
PF: predicated region fallthrough
CT: control target
= control target key end

     0   :  { %s1145_s0 = inlined_call_operand.vmem [shape: f32[8,784], index: 0, kind: input, shape index: {}]   ;;  %s1146_s1 = inlined_call_operand.vmem [shape: f32[784,60], index: 1, kind: input, shape index: {}]   ;;  %s1147_s2 = inlined_call_operand.vmem [shape: f32[1,60], index: 2, kind: input, shape index: {}]   ;;  %s1148_s3 = inlined_call_operand.vmem [shape: f32[60,120], index: 3, kind: input, shape index: {}]   ;;  %s1149_s4 = inlined_call_operand.vmem [shape: f32[1,120], index: 4, kind: input, shape index: {}]   ;;  %s1150_s5 = inlined_call_operand.vmem [shape: f32[120,10], index: 5, kind: input, shape index: {}]   ;;  %s1151_s6 = inlined_call_operand.vmem [shape: f32[1,10], index: 6, kind: input, shape index: {}]   ;;  %s1152_s7 = inlined_call_operand.hbm [shape: f32[8,10], index: 7, kind: output, shape index: {}]  }
   0x1   :  { %v58_v0 = vld [vmem:[%s1146_s1 + $0x80] sm:$0xff]  ;;  %v59_v1 = vld [vmem:[%s1146_s1 + $0x88] sm:$0xff]  ;;  %v60_v11 = vld [vmem:[%s1146_s1 + $0x90] sm:$0xff] }
   0x2   :  { %v42_v2 = vld [vmem:[%s1146_s1] sm:$0xff]  ;;  %v148_v3 = vpack.c.bf16 %v59_v1, %v58_v0  ;;  %v43_v4 = vld [vmem:[%s1146_s1 + $0x8] sm:$0xff]  ;;  %v61_v13 = vld [vmem:[%s1146_s1 + $0x98] sm:$0xff] }
   0x3   :  { %v90_v5 = vld [vmem:[%s1146_s1 + $0x180] sm:$0xff]  ;;  %v91_v6 = vld [vmem:[%s1146_s1 + $0x188] sm:$0xff]  ;;  %v140_v7 = vpack.c.bf16 %v43_v4, %v42_v2  ;;  %v44_v14 = vld [vmem:[%s1146_s1 + $0x10] sm:$0xff]  ;;  %v149_v16 = vpack.c.bf16 %v61_v13, %v60_v11 }
   0x4   :  { %v164_v8 = vpack.c.bf16 %v91_v6, %v90_v5  ;;  %v74_v9 = vld [vmem:[%s1146_s1 + $0x100] sm:$0xff]  ;;  %v75_v10 = vld [vmem:[%s1146_s1 + $0x108] sm:$0xff]  ;;  %531 = vmatprep.subr.bf16.mxu0 %v148_v3  ;;  %v45_v15 = vld [vmem:[%s1146_s1 + $0x18] sm:$0xff] }
   0x5   :  { %v156_v12 = vpack.c.bf16 %v75_v10, %v74_v9  ;;  %532 = vmatpush3.bf16.msra.mxu0 %v140_v7  ;;  %v141_v17 = vpack.c.bf16 %v45_v15, %v44_v14  ;;  %v92_v18 = vld [vmem:[%s1146_s1 + $0x190] sm:$0xff]  ;;  %v93_v19 = vld [vmem:[%s1146_s1 + $0x198] sm:$0xff]  ;;  %v62_v23 = vld [vmem:[%s1146_s1 + $0xa0] sm:$0xff] }
   0x6   :  { %553 = vmatprep.subr.bf16.mxu1 %v164_v8  ;;  %v76_v20 = vld [vmem:[%s1146_s1 + $0x110] sm:$0xff]  ;;  %v165_v21 = vpack.c.bf16 %v93_v19, %v92_v18  ;;  %v77_v22 = vld [vmem:[%s1146_s1 + $0x118] sm:$0xff]  ;;  %v63_v24 = vld [vmem:[%s1146_s1 + $0xa8] sm:$0xff]  ;;  %533 = vmatprep.subr.bf16.mxu0 %v149_v16 }
   0x7   :  { %554 = vmatpush3.bf16.msra.mxu1 %v156_v12  ;;  %v157_v25 = vpack.c.bf16 %v77_v22, %v76_v20  ;;  %v150_v26 = vpack.c.bf16 %v63_v24, %v62_v23  ;;  %v46_v27 = vld [vmem:[%s1146_s1 + $0x20] sm:$0xff]  ;;  %v47_v28 = vld [vmem:[%s1146_s1 + $0x28] sm:$0xff]  ;;  %v64_v35 = vld [vmem:[%s1146_s1 + $0xb0] sm:$0xff] }
   0x8   :  { %v94_v29 = vld [vmem:[%s1146_s1 + $0x1a0] sm:$0xff]  ;;  %555 = vmatprep.subr.bf16.mxu1 %v165_v21  ;;  %v95_v30 = vld [vmem:[%s1146_s1 + $0x1a8] sm:$0xff]  ;;  %v142_v33 = vpack.c.bf16 %v47_v28, %v46_v27  ;;  %v65_v36 = vld [vmem:[%s1146_s1 + $0xb8] sm:$0xff] }
   0x9   :  { %v78_v31 = vld [vmem:[%s1146_s1 + $0x120] sm:$0xff]  ;;  %v79_v32 = vld [vmem:[%s1146_s1 + $0x128] sm:$0xff]  ;;  %534 = vmatpush3.bf16.msra.mxu0 %v141_v17  ;;  %v166_v34 = vpack.c.bf16 %v95_v30, %v94_v29  ;;  %v48_v37 = vld [vmem:[%s1146_s1 + $0x30] sm:$0xff]  ;;  %v151_v39 = vpack.c.bf16 %v65_v36, %v64_v35 }
   0xa   :  { %535 = vmatprep.subr.bf16.mxu0 %v150_v26  ;;  %v158_v38 = vpack.c.bf16 %v79_v32, %v78_v31  ;;  %v49_v40 = vld [vmem:[%s1146_s1 + $0x38] sm:$0xff]  ;;  %v96_v41 = vld [vmem:[%s1146_s1 + $0x1b0] sm:$0xff]  ;;  %v66_v46 = vld [vmem:[%s1146_s1 + $0xc0] sm:$0xff] }
   0xb   :  { %556 = vmatpush3.bf16.msra.mxu1 %v157_v25  ;;  %v97_v42 = vld [vmem:[%s1146_s1 + $0x1b8] sm:$0xff]  ;;  %v80_v44 = vld [vmem:[%s1146_s1 + $0x130] sm:$0xff]  ;;  %v67_v47 = vld [vmem:[%s1146_s1 + $0xc8] sm:$0xff]  ;;  %v143_v48 = vpack.c.bf16 %v49_v40, %v48_v37 }
   0xc   :  { %557 = vmatprep.subr.bf16.mxu1 %v166_v34  ;;  %v167_v43 = vpack.c.bf16 %v97_v42, %v96_v41  ;;  %v81_v45 = vld [vmem:[%s1146_s1 + $0x138] sm:$0xff]  ;;  %v98_v49 = vld [vmem:[%s1146_s1 + $0x1c0] sm:$0xff]  ;;  %v99_v50 = vld [vmem:[%s1146_s1 + $0x1c8] sm:$0xff]  ;;  %v152_v52 = vpack.c.bf16 %v67_v47, %v66_v46 }
   0xd   :  { %536 = vmatpush3.bf16.msra.mxu0 %v142_v33  ;;  %v159_v51 = vpack.c.bf16 %v81_v45, %v80_v44  ;;  %v50_v53 = vld [vmem:[%s1146_s1 + $0x40] sm:$0xff]  ;;  %v51_v54 = vld [vmem:[%s1146_s1 + $0x48] sm:$0xff]  ;;  %v168_v56 = vpack.c.bf16 %v99_v50, %v98_v49  ;;  %v68_v58 = vld [vmem:[%s1146_s1 + $0xd0] sm:$0xff] }
   0xe   :  { %537 = vmatprep.subr.bf16.mxu0 %v151_v39  ;;  %v82_v55 = vld [vmem:[%s1146_s1 + $0x140] sm:$0xff]  ;;  %v83_v57 = vld [vmem:[%s1146_s1 + $0x148] sm:$0xff]  ;;  %v69_v59 = vld [vmem:[%s1146_s1 + $0xd8] sm:$0xff]  ;;  %v144_v62 = vpack.c.bf16 %v51_v54, %v50_v53 }
   0xf   :  { %558 = vmatpush3.bf16.msra.mxu1 %v158_v38  ;;  %v100_v60 = vld [vmem:[%s1146_s1 + $0x1d0] sm:$0xff]  ;;  %v101_v61 = vld [vmem:[%s1146_s1 + $0x1d8] sm:$0xff]  ;;  %v160_v63 = vpack.c.bf16 %v83_v57, %v82_v55  ;;  %v153_v0 = vpack.c.bf16 %v69_v59, %v68_v58  ;;  %v70_v6 = vld [vmem:[%s1146_s1 + $0xe0] sm:$0xff]  ;;  %v678_v55 = vmov 0.0  }
  0x10   :  { %559 = vmatprep.subr.bf16.mxu1 %v167_v43  ;;  %v52_v1 = vld [vmem:[%s1146_s1 + $0x50] sm:$0xff]  ;;  %v53_v2 = vld [vmem:[%s1146_s1 + $0x58] sm:$0xff]  ;;  %v169_v4 = vpack.c.bf16 %v101_v61, %v100_v60  ;;  %v71_v7 = vld [vmem:[%s1146_s1 + $0xe8] sm:$0xff] }
  0x11   :  { %538 = vmatpush3.bf16.msra.mxu0 %v143_v48  ;;  %v84_v3 = vld [vmem:[%s1146_s1 + $0x150] sm:$0xff]  ;;  %v85_v5 = vld [vmem:[%s1146_s1 + $0x158] sm:$0xff]  ;;  %v102_v8 = vld [vmem:[%s1146_s1 + $0x1e0] sm:$0xff]  ;;  %v145_v10 = vpack.c.bf16 %v53_v2, %v52_v1  ;;  %v154_v14 = vpack.c.bf16 %v71_v7, %v70_v6 }
  0x12   :  { %539 = vmatprep.subr.bf16.mxu0 %v152_v52  ;;  %v103_v9 = vld [vmem:[%s1146_s1 + $0x1e8] sm:$0xff]  ;;  %v54_v11 = vld [vmem:[%s1146_s1 + $0x60] sm:$0xff]  ;;  %v161_v13 = vpack.c.bf16 %v85_v5, %v84_v3  ;;  %v72_v20 = vld [vmem:[%s1146_s1 + $0xf0] sm:$0xff] }
  0x13   :  { %560 = vmatpush3.bf16.msra.mxu1 %v159_v51  ;;  %v29_v12 = vld [vmem:[%s1145_s0 + $0x8] sm:$0xff]  ;;  %v86_v16 = vld [vmem:[%s1146_s1 + $0x160] sm:$0xff]  ;;  %v170_v19 = vpack.c.bf16 %v103_v9, %v102_v8  ;;  %v73_v21 = vld [vmem:[%s1146_s1 + $0xf8] sm:$0xff] }
  0x14   :  { %561 = vmatprep.subr.bf16.mxu1 %v168_v56  ;;  %v55_v15 = vld [vmem:[%s1146_s1 + $0x68] sm:$0xff]  ;;  %v36_v18 = vpack.c.bf16 %v29_v12, %v29_v12  ;;  %v31_v22 = vld [vmem:[%s1145_s0 + $0x18] sm:$0xff]  ;;  %v104_v23 = vld [vmem:[%s1146_s1 + $0x1f0] sm:$0xff]  ;;  %v155_v28 = vpack.c.bf16 %v73_v21, %v72_v20 }
  0x15   :  { %540 = vmatpush3.bf16.msra.mxu0 %v144_v62  ;;  %v87_v17 = vld [vmem:[%s1146_s1 + $0x168] sm:$0xff]  ;;  %v105_v24 = vld [vmem:[%s1146_s1 + $0x1f8] sm:$0xff]  ;;  %v38_v25 = vpack.c.bf16 %v31_v22, %v31_v22  ;;  %v146_v26 = vpack.c.bf16 %v55_v15, %v54_v11  ;;  %v56_v29 = vld [vmem:[%s1146_s1 + $0x70] sm:$0xff] }
  0x16   :  { %541 = vmatprep.subr.bf16.mxu0 %v153_v0  ;;  %232 = vmatprep.mubr.bf16.mxu0 %v36_v18  ;;  %v162_v27 = vpack.c.bf16 %v87_v17, %v86_v16  ;;  %v57_v30 = vld [vmem:[%s1146_s1 + $0x78] sm:$0xff]  ;;  %v88_v31 = vld [vmem:[%s1146_s1 + $0x170] sm:$0xff]  ;;  %v171_v32 = vpack.c.bf16 %v105_v24, %v104_v23  ;;  %v122_v34 = vld [vmem:[%s1146_s1 + $0x280] sm:$0xff] }
  0x17   :  { %562 = vmatpush3.bf16.msra.mxu1 %v160_v63  ;;  %v89_v33 = vld [vmem:[%s1146_s1 + $0x178] sm:$0xff]  ;;  %v123_v35 = vld [vmem:[%s1146_s1 + $0x288] sm:$0xff]  ;;  %272 = vmatprep.mubr.bf16.mxu1 %v38_v25  ;;  %v147_v36 = vpack.c.bf16 %v57_v30, %v56_v29  ;;  %v28_v37 = vld [vmem:[%s1145_s0] sm:$0xff] }
  0x18   :  { %563 = vmatprep.subr.bf16.mxu1 %v169_v4  ;;  %v163_v38 = vpack.c.bf16 %v89_v33, %v88_v31  ;;  %v180_v39 = vpack.c.bf16 %v123_v35, %v122_v34  ;;  %v106_v40 = vld [vmem:[%s1146_s1 + $0x200] sm:$0xff]  ;;  %v107_v41 = vld [vmem:[%s1146_s1 + $0x208] sm:$0xff]  ;;  %v30_v42 = vld [vmem:[%s1145_s0 + $0x10] sm:$0xff]  ;;  %v35_v45 = vpack.c.bf16 %v28_v37, %v28_v37 }
  0x19   :  { %542 = vmatpush3.bf16.msra.mxu0 %v145_v10  ;;  %v124_v43 = vld [vmem:[%s1146_s1 + $0x290] sm:$0xff]  ;;  %v125_v44 = vld [vmem:[%s1146_s1 + $0x298] sm:$0xff]  ;;  %v172_v46 = vpack.c.bf16 %v107_v41, %v106_v40  ;;  %v37_v47 = vpack.c.bf16 %v30_v42, %v30_v42  ;;  %v33_v51 = vld [vmem:[%s1145_s0 + $0x28] sm:$0xff] }
  0x1a   :  { %543 = vmatprep.subr.bf16.mxu0 %v154_v14  ;;  %v181_v48 = vpack.c.bf16 %v125_v44, %v124_v43  ;;  %v108_v49 = vld [vmem:[%s1146_s1 + $0x210] sm:$0xff]  ;;  %v109_v50 = vld [vmem:[%s1146_s1 + $0x218] sm:$0xff]  ;;  %v126_v52 = vld [vmem:[%s1146_s1 + $0x2a0] sm:$0xff]  ;;  %v40_v54 = vpack.c.bf16 %v33_v51, %v33_v51 }
  0x1b   :  { %564 = vmatpush3.bf16.msra.mxu1 %v161_v13  ;;  %v127_v53 = vld [vmem:[%s1146_s1 + $0x2a8] sm:$0xff] }
  0x1c   :  { %565 = vmatprep.subr.bf16.mxu1 %v170_v19 }
  0x1d   :  { %544 = vmatpush3.bf16.msra.mxu0 %v146_v26 }
  0x1e   :  { %545 = vmatprep.subr.bf16.mxu0 %v155_v28 }
  0x1f   :  { %566 = vmatpush3.bf16.msra.mxu1 %v162_v27 }
  0x20   :  { %567 = vmatprep.subr.bf16.mxu1 %v171_v32 }
  0x21   :  { %546 = vmatpush3.bf16.msra.mxu0 %v147_v36 }
  0x22   :  { %575 = vmatprep.subr.bf16.mxu0 %v180_v39 }
  0x23   :  { %568 = vmatpush3.bf16.msra.mxu1 %v163_v38 }
  0x24   :  { %619 = vmatprep.subr.bf16.mxu1 %v678_v55  ;;  %233 = vmatmul.mubr.bf16.vlgmr.msra.gmra.mrb[0].mxu0 %v35_v45 }
  0x25   :  { %12 = vsyncpa [#allocation3], 0  ;;  %576 = vmatpush3.bf16.msra.mxu0 %v172_v46  ;;  %v173_v56 = vpack.c.bf16 %v109_v50, %v108_v49  ;;  %v182_v57 = vpack.c.bf16 %v127_v53, %v126_v52  ;;  %v110_v58 = vld [vmem:[%s1146_s1 + $0x220] sm:$0xff]  ;;  %v111_v59 = vld [vmem:[%s1146_s1 + $0x228] sm:$0xff]  ;;  %312 = vmatprep.mubr.bf16.mxu0 %v40_v54  ;;  %vm679_vm0 = vmmov 0   ;;  %vm196_vm1 = vcmask 130048  }
  0x26   :  { %273 = vmatmul.mubr.bf16.vlgmr.msra.gmra.mrb[0].mxu1 %v37_v47  ;;  %577 = vmatprep.subr.bf16.mxu0 %v181_v48  ;;  %v128_v60 = vld [vmem:[%s1146_s1 + $0x2b0] sm:$0xff]  ;;  %v129_v61 = vld [vmem:[%s1146_s1 + $0x2b8] sm:$0xff]  ;;  %v174_v62 = vpack.c.bf16 %v111_v59, %v110_v58  ;;  %v130_v2 = vld [vmem:[%s1146_s1 + $0x2c0] sm:$0xff]  ;;  %vm385_vm2 = vcmask 1045504   ;;  %vm381_vm3 = vcmask 490496   ;;  %vm465_vm4 = vcmask 1043456  }
  0x27   :  { %627 = vmatprep.mubr.msk.bf16.mxu1 %vm679_vm0, %v678_v55  ;;  %v183_v63 = vpack.c.bf16 %v129_v61, %v128_v60  ;;  %v112_v0 = vld [vmem:[%s1146_s1 + $0x230] sm:$0xff]  ;;  %v113_v1 = vld [vmem:[%s1146_s1 + $0x238] sm:$0xff]  ;;  %v131_v3 = vld [vmem:[%s1146_s1 + $0x2c8] sm:$0xff]  ;;  %vm461_vm5 = vcmask 982016   ;;  %s680_s24 = smov [#allocation2]   ;;  %vm509_vm6 = vcmask 80896  }
  0x28   :  { %v175_v4 = vpack.c.bf16 %v113_v1, %v112_v0  ;;  %v184_v5 = vpack.c.bf16 %v131_v3, %v130_v2  ;;  %v114_v6 = vld [vmem:[%s1146_s1 + $0x240] sm:$0xff]  ;;  %v115_v7 = vld [vmem:[%s1146_s1 + $0x248] sm:$0xff]  ;;  %v132_v8 = vld [vmem:[%s1146_s1 + $0x2d0] sm:$0xff]  ;;  %s517_s25 = sshll.u32 %s680_s24, 4  ;;  %s518_s25 = int_to_ptr.vmem [resolvable:$true] %s517_s25 }
  0x29   :  { %578 = vmatpush3.bf16.msra.mxu0 %v173_v56  ;;  %v133_v9 = vld [vmem:[%s1146_s1 + $0x2d8] sm:$0xff]  ;;  %v176_v10 = vpack.c.bf16 %v115_v7, %v114_v6  ;;  %v116_v12 = vld [vmem:[%s1146_s1 + $0x250] sm:$0xff]  ;;  %v134_v14 = vld [vmem:[%s1146_s1 + $0x2e0] sm:$0xff]  ;;  %p659_p1 = scmp.lt.s32.totalorder %s518_s25, %s518_s25 }
  0x2a   :  { %579 = vmatprep.subr.bf16.mxu0 %v182_v57  ;;  %v185_v11 = vpack.c.bf16 %v133_v9, %v132_v8  ;;  %v117_v13 = vld [vmem:[%s1146_s1 + $0x258] sm:$0xff]  ;;  %v135_v15 = vld [vmem:[%s1146_s1 + $0x2e8] sm:$0xff]  ;;  %v118_v18 = vld [vmem:[%s1146_s1 + $0x260] sm:$0xff] }
  0x2b   :  { %v177_v16 = vpack.c.bf16 %v117_v13, %v116_v12  ;;  %v186_v17 = vpack.c.bf16 %v135_v15, %v134_v14  ;;  %v119_v19 = vld [vmem:[%s1146_s1 + $0x268] sm:$0xff]  ;;  %v136_v20 = vld [vmem:[%s1146_s1 + $0x2f0] sm:$0xff]  ;;  %v137_v21 = vld [vmem:[%s1146_s1 + $0x2f8] sm:$0xff] }
  0x2c   :  { %v178_v22 = vpack.c.bf16 %v119_v19, %v118_v18  ;;  %v187_v23 = vpack.c.bf16 %v137_v21, %v136_v20  ;;  %v120_v24 = vld [vmem:[%s1146_s1 + $0x270] sm:$0xff]  ;;  %v121_v25 = vld [vmem:[%s1146_s1 + $0x278] sm:$0xff]  ;;  %v32_v27 = vld [vmem:[%s1145_s0 + $0x20] sm:$0xff] }
  0x2d   :  { %580 = vmatpush3.bf16.msra.mxu0 %v174_v62  ;;  %v179_v26 = vpack.c.bf16 %v121_v25, %v120_v24  ;;  %v138_v28 = vld [vmem:[%s1146_s1 + $0x300] sm:$0xff]  ;;  %v139_v29 = vld [vmem:[%s1146_s1 + $0x308] sm:$0xff]  ;;  %v39_v30 = vpack.c.bf16 %v32_v27, %v32_v27  ;;  %v34_v32 = vld [vmem:[%s1145_s0 + $0x30] sm:$0xff] }
  0x2e   :  { %581 = vmatprep.subr.bf16.mxu0 %v183_v63  ;;  %v188_v31 = vpack.c.bf16 %v139_v29, %v138_v28  ;;  %v41_v33 = vpack.c.bf16 %v34_v32, %v34_v32  ;;  %v362_v34 = vld [vmem:[%s1148_s3] sm:$0xff]  ;;  %v363_v35 = vld [vmem:[%s1148_s3 + $0x8] sm:$0xff]  ;;  %v364_v37 = vld [vmem:[%s1148_s3 + $0x10] sm:$0xff] }
  0x2f   :  { %v370_v36 = vpack.c.bf16 %v363_v35, %v362_v34  ;;  %v365_v38 = vld [vmem:[%s1148_s3 + $0x18] sm:$0xff]  ;;  %v366_v40 = vld [vmem:[%s1148_s3 + $0x20] sm:$0xff]  ;;  %v367_v41 = vld [vmem:[%s1148_s3 + $0x28] sm:$0xff] }
  0x30   :  { %v371_v39 = vpack.c.bf16 %v365_v38, %v364_v37  ;;  %v372_v42 = vpack.c.bf16 %v367_v41, %v366_v40  ;;  %v368_v43 = vld [vmem:[%s1148_s3 + $0x30] sm:$0xff]  ;;  %v369_v44 = vld [vmem:[%s1148_s3 + $0x38] sm:$0xf]  ;;  %v525_v48 = vld [vmem:[%s1147_s2] ss:$0 sm:$0xff] }
  0x31   :  { %582 = vmatpush3.bf16.msra.mxu0 %v175_v4  ;;  %620 = vmatpush3.bf16.msra.mxu1 %v370_v36  ;;  %v373_v45 = vpack.c.bf16 %v369_v44, %v368_v43  ;;  %v431_v6 = vld [vmem:[%s1150_s5] sm:$0xff]  ;;  %v432_v7 = vld [vmem:[%s1150_s5 + $0x8] sm:$0xff]  ;;  %v433_v13 = vld [vmem:[%s1150_s5 + $0x10] sm:$0xff] }
  0x32   :  { %583 = vmatprep.subr.bf16.mxu0 %v184_v5  ;;  %621 = vmatprep.subr.bf16.mxu1 %v678_v55  ;;  %v434_v14 = vld [vmem:[%s1150_s5 + $0x18] sm:$0xff]  ;;  %v437_v19 = vld [vmem:[%s1150_s5 + $0x30] sm:$0xff]  ;;  %v443_v28 = vld [vmem:[%s1150_s5 + $0x60] sm:$0xff] }
  0x33   :  { %v387_v46 = vsel %vm385_vm2, %v373_v45, 0  ;;  %v447_v15 = vpack.c.bf16 %v434_v14, %v433_v13  ;;  %v438_v20 = vld [vmem:[%s1150_s5 + $0x38] sm:$0xff]  ;;  %v441_v25 = vld [vmem:[%s1150_s5 + $0x50] sm:$0xff]  ;;  %v444_v29 = vld [vmem:[%s1150_s5 + $0x68] sm:$0xff] }
  0x34   :  { %v449_v21 = vpack.c.bf16 %v438_v20, %v437_v19  ;;  %v527_v34 = vld [vmem:[%s1149_s4] ss:$0 sm:$0xff]  ;;  %s654_s4 = scalar_lea.vmem %s518_s25, 128 }
  0x35   :  { %584 = vmatpush3.bf16.msra.mxu0 %v176_v10  ;;  %622 = vmatpush3.bf16.msra.mxu1 %v371_v39  ;;  %p655_p0 = scmp.ne.s32.totalorder %s518_s25, %s654_s4  ;;  %p660_p2 = scmp.lt.s32.totalorder %s654_s4, %s654_s4 }
  0x36   :  { %585 = vmatprep.subr.bf16.mxu0 %v185_v11  ;;  %623 = vmatprep.subr.bf16.mxu1 %v678_v55  ;;  %v446_v11 = vpack.c.bf16 %v432_v7, %v431_v6 }
  0x37   :  { %p661_p3 = por %p660_p2, %p659_p1 }
  0x39   :  { %586 = vmatpush3.bf16.msra.mxu0 %v177_v16  ;;  %624 = vmatpush3.bf16.msra.mxu1 %v372_v42  ;;  %v435_v16 = vld [vmem:[%s1150_s5 + $0x20] sm:$0xff]  ;;  %p662_p4 = pnand %p661_p3, %p655_p0 }
  0x3a   :  { %587 = vmatprep.subr.bf16.mxu0 %v186_v17  ;;  %625 = vmatprep.subr.bf16.mxu1 %v678_v55  ;;  %v436_v17 = vld [vmem:[%s1150_s5 + $0x28] sm:$0xff] }
  0x3b   :  { %v448_v18 = vpack.c.bf16 %v436_v17, %v435_v16 }
  0x3d   :  { %588 = vmatpush3.bf16.msra.mxu0 %v178_v22  ;;  %626 = vmatpush3.bf16.msra.mxu1 %v387_v46  ;;  %v439_v22 = vld [vmem:[%s1150_s5 + $0x40] sm:$0xff] }
  0x3e   :  { %589 = vmatprep.subr.bf16.mxu0 %v187_v23  ;;  %631 = vmatprep.subr.bf16.mxu1 %v678_v55  ;;  %v440_v23 = vld [vmem:[%s1150_s5 + $0x48] sm:$0xff] }
  0x3f   :  { %v450_v24 = vpack.c.bf16 %v440_v23, %v439_v22 }
  0x41   :  { %590 = vmatpush3.bf16.msra.mxu0 %v179_v26  ;;  %v442_v26 = vld [vmem:[%s1150_s5 + $0x58] sm:$0xff] }
  0x42   :  { %613 = vmatprep.subr.bf16.mxu0 %v678_v55  ;;  %v451_v27 = vpack.c.bf16 %v442_v26, %v441_v25 }
  0x44   :  { %313 = vmatmul.mubr.bf16.vlgmr.msra.gmra.mrb[4].mxu0 %v39_v30  ;;  %v452_v30 = vpack.c.bf16 %v444_v29, %v443_v28 }
  0x45   :  { %614 = vmatpush3.bf16.msra.mxu0 %v188_v31  ;;  %615 = vmatprep.mubr.msk.bf16.mxu0 %vm679_vm0, %v678_v55  ;;  %v445_v31 = vld [vmem:[%s1150_s5 + $0x70] sm:$0xff] }
  0x46   :  { %v453_v32 = vpack.c.bf16 %v445_v31, %v445_v31 }
  0x4c   :  { %616 = vmatmul.mubr.msk.bf16.vlgmr.msra.gmra.mrb[8].mxu0 %vm196_vm1, %v41_v33  ;;  %v467_v33 = vsel %vm465_vm4, %v453_v32, 0 }
  0xf7   :  { %v547_v47 = vpop.f32.mrb[0].mxu0 }
  0xf8   :  { %v548_v49 = vpop.f32.mrb[1].mxu0 }
  0xf9   :  { %v569_v50 = vpop.f32.mrb[0].mxu1  ;;  %v549_v51 = vadd.f32 %v548_v49, %v547_v47  ;;  %v550_v52 = vpop.f32.mrb[2].mxu0 }
  0xfa   :  { %v570_v53 = vpop.f32.mrb[1].mxu1  ;;  %v551_v54 = vpop.f32.mrb[3].mxu0 }
  0xfb   :  { %v571_v56 = vadd.f32 %v570_v53, %v569_v50  ;;  %v572_v57 = vpop.f32.mrb[2].mxu1  ;;  %v235_v58 = vadd.f32 %v549_v51, %v525_v48 }
  0xfc   :  { %v573_v59 = vpop.f32.mrb[3].mxu1 }
  0xfd   :  { %v275_v60 = vadd.f32 %v571_v56, %v235_v58 }
 0x117   :  { %v591_v61 = vpop.f32.mrb[4].mxu0 }
 0x118   :  { %v592_v62 = vpop.f32.mrb[5].mxu0 }
 0x119   :  { %v593_v63 = vadd.f32 %v592_v62, %v591_v61  ;;  %v594_v0 = vpop.f32.mrb[6].mxu0 }
 0x11a   :  { %v595_v1 = vpop.f32.mrb[7].mxu0 }
 0x11b   :  { %v315_v2 = vadd.f32 %v593_v63, %v275_v60 }
 0x11f   :  { %v354_v3 = vpop.f32.mrb[8].mxu0 }
 0x120   :  { %v355_v4 = vadd.f32 %v354_v3, %v315_v2  ;;  %v617_v5 = vpop.f32.mrb[9].mxu0 }
 0x121   :  { %v357_v8 = vpop.f32.mrb[10].mxu0 }
 0x122   :  { %v360_v9 = vmax.f32 %v355_v4, 0.0  ;;  %v618_v10 = vpop.f32.mrb[11].mxu0 }
 0x124   :  { %v361_v12 = vpack.c.bf16 %v360_v9, %v360_v9 }
 0x126   :  { %628 = vmatmul.mubr.msk.bf16.vlgmr.msra.gmra.mrb[4].mxu1 %vm381_vm3, %v361_v12 }
 0x127   :  { %632 = vmatpush3.bf16.msra.mxu1 %v446_v11  ;;  %647 = vmatprep.mubr.msk.bf16.mxu1 %vm679_vm0, %v678_v55 }
 0x128   :  { %633 = vmatprep.subr.bf16.mxu1 %v678_v55 }
 0x12b   :  { %634 = vmatpush3.bf16.msra.mxu1 %v447_v15 }
 0x12c   :  { %635 = vmatprep.subr.bf16.mxu1 %v678_v55 }
 0x12f   :  { %636 = vmatpush3.bf16.msra.mxu1 %v448_v18 }
 0x130   :  { %637 = vmatprep.subr.bf16.mxu1 %v678_v55 }
 0x133   :  { %638 = vmatpush3.bf16.msra.mxu1 %v449_v21 }
 0x134   :  { %639 = vmatprep.subr.bf16.mxu1 %v678_v55 }
 0x137   :  { %640 = vmatpush3.bf16.msra.mxu1 %v450_v24 }
 0x138   :  { %641 = vmatprep.subr.bf16.mxu1 %v678_v55 }
 0x13b   :  { %642 = vmatpush3.bf16.msra.mxu1 %v451_v27 }
 0x13c   :  { %643 = vmatprep.subr.bf16.mxu1 %v678_v55 }
 0x13f   :  { %644 = vmatpush3.bf16.msra.mxu1 %v452_v30 }
 0x140   :  { %645 = vmatprep.subr.bf16.mxu1 %v678_v55  ;;  %v529_v55 = vld [vmem:[%s1151_s6] ss:$0 sm:$0xff] }
 0x143   :  { %646 = vmatpush3.bf16.msra.mxu1 %v467_v33 }
 0x1f9   :  { %v423_v35 = vpop.f32.mrb[4].mxu1 }
 0x1fa   :  { %v424_v36 = vadd.f32 %v527_v34, %v423_v35  ;;  %v629_v37 = vpop.f32.mrb[5].mxu1 }
 0x1fb   :  { %v426_v38 = vpop.f32.mrb[6].mxu1 }
 0x1fc   :  { %v429_v39 = vmax.f32 %v424_v36, 0.0  ;;  %v630_v40 = vpop.f32.mrb[7].mxu1 }
 0x1fe   :  { %v430_v41 = vpack.c.bf16 %v429_v39, %v429_v39 }
 0x200   :  { %648 = vmatmul.mubr.msk.bf16.vlgmr.msra.gmra.mrb[8].mxu1 %vm461_vm5, %v430_v41 }
 0x2d3   :  { %v503_v42 = vpop.f32.mrb[8].mxu1 }
 0x2d4   :  { %v504_v43 = vadd.f32 %v529_v55, %v503_v42  ;;  %v649_v44 = vpop.f32.mrb[9].mxu1 }
 0x2d5   :  { %v506_v45 = vpop.f32.mrb[10].mxu1 }
 0x2d6   :  { %v650_v46 = vpop.f32.mrb[11].mxu1  ;;  %510 = vst.msk [vmem:[#allocation2] sm:$0xff] %vm509_vm6, %v504_v43 }
 0x2d7   :  { %665 = shalt.err (!%p662_p4)
}
 0x2d8   :  { %s666_s6 = scalar_lea.hbm %s1152_s7, 128 }
 0x2d9   :  { %p667_p5 = scmp.ne.s32.totalorder %s1152_s7, %s666_s6  ;;  %p670_p6 = scmp.lt.u32.totalorder %s666_s6, %s1152_s7 }
 0x2db   :  { %p672_p7 = pnand %p670_p6, %p667_p5 }
 0x2dd   :  { %675 = shalt.err (!%p672_p7)
}
 0x2de   :  { %520 = dma.vmem_to_hbm [thread:$0]  %s518_s25, 128, %s1152_s7, [#allocation3]  }
 0x2df   :  { %676 = dma.done.wait [#allocation3], 128  }
 0x2e0   :  { %677 = vsyncadd [#allocation3], 4294967168 }
 0x2e1   :  { %524 = vsyncpa [#allocation3], 1 }

</bundles_post_ra>
